<compile_context>
chip_gen: v7x
topology: tpu7x:2x2x1
jax: 0.10.0
libtpu: 0.0.40
codegen_flags: <defaults>
</compile_context>

<pallas_src>
import math

import numpy as np
import jax
import jax.numpy as jnp
from jax import lax
from jax.experimental import pallas as pl
from jax.experimental.pallas import tpu as pltpu

# Small, module-consistent shapes.
S, B, D, H, DFF = 8, 2, 32, 4, 64
HD = D // H
N = S * B
LN_EPS = 1e-5
NEG = -1e30  # additive mask value for cross-batch score entries


def _layernorm(x, w, b):
    mu = jnp.mean(x, axis=-1, keepdims=True)
    var = jnp.mean((x - mu) ** 2, axis=-1, keepdims=True)
    return (x - mu) * lax.rsqrt(var + LN_EPS) * w + b


def encoder_kernel(x_ref, win_ref, wouth_ref, w1_ref, w2_ref, c_ref,
                   out_ref, attn_ref):
    """Whole encoder layer on the (S*B, D) slab (row r = s*B + b).

    x_ref:     (N, D)      f32   input slab
    win_ref:   (D, 3D)     bf16  in-proj weight, pre-transposed, q rows pre-scaled
    wouth_ref: (H, HD, D)  bf16  out-proj weight, pre-transposed, split per head
    w1_ref:    (D, DFF)    bf16  linear1 weight, pre-transposed
    w2_ref:    (DFF, D)    bf16  linear2 weight, pre-transposed
    c_ref:     (8+N, 128)  f32   packed biases / LN params / mask / selectors
    out_ref:   (N, D)      f32   output slab (same row order as input)
    attn_ref:  (N, S)      f32   head-averaged attention, row = b*S + s
    """
    X = x_ref[...]                                   # (N, D) f32
    C = c_ref[...]                                   # (8+N, 128) f32
    in_b = C[0:1, 0:3 * D]                           # (1, 3D)  (q part pre-scaled)
    b1 = C[1:2, 0:DFF]
    out_b = C[2:3, 0:D]
    b2 = C[3:4, 0:D]
    n1w, n1b = C[4:5, 0:D], C[5:6, 0:D]
    n2w, n2b = C[6:7, 0:D], C[7:8, 0:D]
    neg_mask = C[8:8 + N, 0:N]                       # (N, N): 0 same-batch, -1e30 else

    # ---- fused QKV in-projection over the whole slab (bf16 MXU, f32 acc) ----
    qkv = jnp.dot(X.astype(jnp.bfloat16), win_ref[...],
                  preferred_element_type=jnp.float32) + in_b       # (N, 3D) f32
    qkv16 = qkv.astype(jnp.bfloat16)
    wout = wouth_ref[...]                                          # (H, HD, D) bf16

    proj = jnp.zeros((N, D), jnp.float32)
    p_sum = jnp.zeros((N, N), jnp.float32)
    for h in range(H):                                             # H = 4, unrolled
        qh = qkv16[:, h * HD:(h + 1) * HD]                         # (N, HD)
        kh = qkv16[:, D + h * HD:D + (h + 1) * HD]
        vh = qkv16[:, 2 * D + h * HD:2 * D + (h + 1) * HD]
        # scores over the interleaved slab; contract last dims -> no in-kernel .T
        s_h = lax.dot_general(qh, kh, (((1,), (1,)), ((), ())),
                              preferred_element_type=jnp.float32)  # (N, N)
        s_h = s_h + neg_mask                                       # block cross-batch
        s_h = s_h - jnp.max(s_h, axis=-1, keepdims=True)
        p_h = jnp.exp(s_h)                                         # cross-batch -> 0.0
        p_h = p_h * pl.reciprocal(jnp.sum(p_h, axis=-1, keepdims=True),
                                  approx=True)
        p_sum = p_sum + p_h
        ctx_h = jnp.dot(p_h.astype(jnp.bfloat16), vh,
                        preferred_element_type=jnp.float32)        # (N, HD)
        # per-head slice of the out-projection: no head concatenate needed
        proj = proj + jnp.dot(ctx_h.astype(jnp.bfloat16), wout[h],
                              preferred_element_type=jnp.float32)  # (N, D)

    proj = proj + out_b

    # ---- residual + norm1, FFN, residual + norm2 — whole slab at once ----
    y = _layernorm(X + proj, n1w, n1b)
    hid = jnp.maximum(jnp.dot(y.astype(jnp.bfloat16), w1_ref[...],
                              preferred_element_type=jnp.float32) + b1, 0.0)
    ff = jnp.dot(hid.astype(jnp.bfloat16), w2_ref[...],
                 preferred_element_type=jnp.float32) + b2
    out_ref[...] = _layernorm(y + ff, n2w, n2b)                    # single slab store

    # ---- head-averaged attention weights, row = b*S + s, single slab store ----
    blocks = []
    for b in range(B):                                             # B = 2, unrolled
        selT_b = C[8 + b * S:8 + (b + 1) * S, N:2 * N]             # (S, N)
        sel_b = C[8:8 + N, 2 * N + b * S:2 * N + (b + 1) * S]      # (N, S), holds 1/H
        tmp = jnp.dot(p_sum, sel_b, preferred_element_type=jnp.float32)   # (N, S)
        blocks.append(jnp.dot(selT_b, tmp, preferred_element_type=jnp.float32))
    attn_ref[...] = jnp.concatenate(blocks, axis=0)                # (N, S)


def prep_params(p):
    """One-time host-side prep: pre-transpose weights, fold scales, pack constants."""
    scale = 1.0 / math.sqrt(HD)
    qscale = np.concatenate([np.full(D, scale, np.float32),
                             np.ones(2 * D, np.float32)])
    in_w = np.asarray(p['in_w'], np.float32) * qscale[:, None]      # (3D, D)
    in_b = np.asarray(p['in_b'], np.float32)[0] * qscale            # (3D,)

    win_t = jnp.asarray(in_w.T, jnp.bfloat16)                                   # (D, 3D)
    wout_h = jnp.asarray(np.asarray(p['out_w'], np.float32).T.reshape(H, HD, D),
                         jnp.bfloat16)                                          # (H, HD, D)
    w1_t = jnp.asarray(np.asarray(p['w1'], np.float32).T, jnp.bfloat16)         # (D, DFF)
    w2_t = jnp.asarray(np.asarray(p['w2'], np.float32).T, jnp.bfloat16)         # (DFF, D)

    c = np.zeros((8 + N, 128), np.float32)
    c[0, :3 * D] = in_b
    c[1, :DFF] = np.asarray(p['b1'])[0]
    c[2, :D] = np.asarray(p['out_b'])[0]
    c[3, :D] = np.asarray(p['b2'])[0]
    c[4, :D] = np.asarray(p['n1w'])[0]
    c[5, :D] = np.asarray(p['n1b'])[0]
    c[6, :D] = np.asarray(p['n2w'])[0]
    c[7, :D] = np.asarray(p['n2b'])[0]
    r = np.arange(N)[:, None]
    col = np.arange(N)[None, :]
    c[8:8 + N, :N] = np.where((r % B) == (col % B), 0.0, NEG)       # additive mask
    t = np.arange(S)[None, :]
    for b in range(B):
        sel = (r == t * B + b).astype(np.float32)                   # (N, S)
        c[8:8 + N, 2 * N + b * S:2 * N + (b + 1) * S] = sel / H     # fold 1/H here
        c[8 + b * S:8 + (b + 1) * S, N:2 * N] = sel.T               # (S, N)
    return dict(win=win_t, wout=wout_h, w1=w1_t, w2=w2_t, consts=jnp.asarray(c))


def encoder_layer(src, pp):
    """src: (S, B, D) f32. Returns (out (S, B, D), attn_weights (B, S, S))."""
    x = src.reshape(N, D)                       # free reshape, row r = s*B + b
    vmem = pl.BlockSpec(memory_space=pltpu.MemorySpace.VMEM)
    out_slab, attn_slab = pl.pallas_call(
        encoder_kernel,
        out_shape=(jax.ShapeDtypeStruct((N, D), jnp.float32),
                   jax.ShapeDtypeStruct((N, S), jnp.float32)),
        in_specs=[vmem] * 6,
        out_specs=(vmem, vmem),
    )(x, pp['win'], pp['wout'], pp['w1'], pp['w2'], pp['consts'])
    return out_slab.reshape(S, B, D), attn_slab.reshape(B, S, S)   # free reshapes


def reference(src, p):
    """Pure-JAX f32 mirror of the PyTorch forward (eval mode), for verification."""
    scale = 1.0 / math.sqrt(HD)
    qkv = jnp.einsum('sbd,ed->sbe', src, p['in_w']) + p['in_b'][0]
    q = (qkv[..., :D] * scale).reshape(S, B, H, HD)
    k = qkv[..., D:2 * D].reshape(S, B, H, HD)
    v = qkv[..., 2 * D:].reshape(S, B, H, HD)
    scores = jnp.einsum('sbhe,tbhe->bhst', q, k)
    attn = jax.nn.softmax(scores, axis=-1)                  # (B, H, S, S)
    ctx = jnp.einsum('bhst,tbhe->sbhe', attn, v).reshape(S, B, D)
    proj = ctx @ p['out_w'].T + p['out_b'][0]
    y = _layernorm(src + proj, p['n1w'][0], p['n1b'][0])
    hid = jnp.maximum(y @ p['w1'].T + p['b1'][0], 0.0)
    ff = hid @ p['w2'].T + p['b2'][0]
    z = _layernorm(y + ff, p['n2w'][0], p['n2b'][0])
    return z, attn.sum(axis=1) / H


def make_params(key):
    ks = jax.random.split(key, 12)
    f = jnp.float32
    return {
        'in_w': (jax.random.normal(ks[0], (3 * D, D), f) * 0.1),
        'in_b': (jax.random.normal(ks[1], (1, 3 * D), f) * 0.1),
        'out_w': (jax.random.normal(ks[2], (D, D), f) * 0.1),
        'out_b': (jax.random.normal(ks[3], (1, D), f) * 0.1),
        'w1': (jax.random.normal(ks[4], (DFF, D), f) * 0.1),
        'b1': (jax.random.normal(ks[5], (1, DFF), f) * 0.1),
        'w2': (jax.random.normal(ks[6], (D, DFF), f) * 0.1),
        'b2': (jax.random.normal(ks[7], (1, D), f) * 0.1),
        'n1w': 1.0 + jax.random.normal(ks[8], (1, D), f) * 0.05,
        'n1b': jax.random.normal(ks[9], (1, D), f) * 0.05,
        'n2w': 1.0 + jax.random.normal(ks[10], (1, D), f) * 0.05,
        'n2b': jax.random.normal(ks[11], (1, D), f) * 0.05,
    }


if __name__ == "__main__":
    key = jax.random.PRNGKey(0)
    pkey, xkey = jax.random.split(key)
    params = make_params(pkey)
    src = jax.random.normal(xkey, (S, B, D), jnp.float32)

    prepped = prep_params(params)               # one-time host-side weight prep
    run = jax.jit(encoder_layer)
    out, heads = run(src, prepped)
    jax.block_until_ready((out, heads))

    ref_out, ref_heads = reference(src, params)
    assert out.shape == (S, B, D) and heads.shape == (B, S, S)
    # bf16 MXU operands (per perf guidance) -> slightly looser tolerance than pure f32
    if not (jnp.allclose(out, ref_out, atol=2e-2, rtol=2e-2) and
            jnp.allclose(heads, ref_heads, atol=2e-2, rtol=2e-2)):
        raise AssertionError("Pallas kernel does not match JAX reference")
    print("KERNEL_OK")
</pallas_src>

<mosaic_0001>
module attributes {stable_mosaic.version = 11 : i64} {
  func.func @encoder_kernel(%arg0: memref<16x32xf32, #tpu.memory_space<vmem>>, %arg1: memref<32x96xbf16, #tpu.memory_space<vmem>>, %arg2: memref<4x8x32xbf16, #tpu.memory_space<vmem>>, %arg3: memref<32x64xbf16, #tpu.memory_space<vmem>>, %arg4: memref<64x32xbf16, #tpu.memory_space<vmem>>, %arg5: memref<24x128xf32, #tpu.memory_space<vmem>>, %arg6: memref<16x32xf32, #tpu.memory_space<vmem>>, %arg7: memref<16x8xf32, #tpu.memory_space<vmem>>) attributes {dimension_semantics = [], scalar_prefetch = 0 : i64, scratch_operands = 0 : i64, tpu.core_type = #tpu.core_type<tc>} {
    %c0 = arith.constant 0 : index
    %c0_0 = arith.constant 0 : index
    %0 = vector.load %arg0[%c0, %c0_0] : memref<16x32xf32, #tpu.memory_space<vmem>>, vector<16x32xf32>
    %c0_1 = arith.constant 0 : index
    %c0_2 = arith.constant 0 : index
    %1 = vector.load %arg5[%c0_1, %c0_2] : memref<24x128xf32, #tpu.memory_space<vmem>>, vector<24x128xf32>
    %2 = vector.extract_strided_slice %1 {offsets = [0, 0], sizes = [1, 96], strides = [1, 1]} : vector<24x128xf32> to vector<1x96xf32>
    %3 = vector.extract_strided_slice %1 {offsets = [1, 0], sizes = [1, 64], strides = [1, 1]} : vector<24x128xf32> to vector<1x64xf32>
    %4 = vector.extract_strided_slice %1 {offsets = [2, 0], sizes = [1, 32], strides = [1, 1]} : vector<24x128xf32> to vector<1x32xf32>
    %5 = vector.extract_strided_slice %1 {offsets = [3, 0], sizes = [1, 32], strides = [1, 1]} : vector<24x128xf32> to vector<1x32xf32>
    %6 = vector.extract_strided_slice %1 {offsets = [4, 0], sizes = [1, 32], strides = [1, 1]} : vector<24x128xf32> to vector<1x32xf32>
    %7 = vector.extract_strided_slice %1 {offsets = [5, 0], sizes = [1, 32], strides = [1, 1]} : vector<24x128xf32> to vector<1x32xf32>
    %8 = vector.extract_strided_slice %1 {offsets = [6, 0], sizes = [1, 32], strides = [1, 1]} : vector<24x128xf32> to vector<1x32xf32>
    %9 = vector.extract_strided_slice %1 {offsets = [7, 0], sizes = [1, 32], strides = [1, 1]} : vector<24x128xf32> to vector<1x32xf32>
    %10 = vector.extract_strided_slice %1 {offsets = [8, 0], sizes = [16, 16], strides = [1, 1]} : vector<24x128xf32> to vector<16x16xf32>
    %11 = arith.truncf %0 : vector<16x32xf32> to vector<16x32xbf16>
    %c0_3 = arith.constant 0 : index
    %c0_4 = arith.constant 0 : index
    %12 = vector.load %arg1[%c0_3, %c0_4] : memref<32x96xbf16, #tpu.memory_space<vmem>>, vector<32x96xbf16>
    %cst = arith.constant dense<0.000000e+00> : vector<16x96xf32>
    %13 = tpu.matmul %11, %12, %cst {dimension_numbers = #tpu.dot_dimension_numbers<[1], [0], [0], [1], [0, 0, 1, 1], [], []>} : vector<16x32xbf16>, vector<32x96xbf16>, vector<16x96xf32> -> vector<16x96xf32>
    %14 = vector.broadcast %2 : vector<1x96xf32> to vector<16x96xf32>
    %15 = arith.addf %13, %14 : vector<16x96xf32>
    %16 = arith.truncf %15 : vector<16x96xf32> to vector<16x96xbf16>
    %c0_5 = arith.constant 0 : index
    %c0_6 = arith.constant 0 : index
    %c0_7 = arith.constant 0 : index
    %17 = vector.load %arg2[%c0_5, %c0_6, %c0_7] : memref<4x8x32xbf16, #tpu.memory_space<vmem>>, vector<4x8x32xbf16>
    %cst_8 = arith.constant 0.000000e+00 : f32
    %18 = vector.broadcast %cst_8 : f32 to vector<16x32xf32>
    %cst_9 = arith.constant 0.000000e+00 : f32
    %19 = vector.broadcast %cst_9 : f32 to vector<16x16xf32>
    %20 = vector.extract_strided_slice %16 {offsets = [0, 0], sizes = [16, 8], strides = [1, 1]} : vector<16x96xbf16> to vector<16x8xbf16>
    %21 = vector.extract_strided_slice %16 {offsets = [0, 32], sizes = [16, 8], strides = [1, 1]} : vector<16x96xbf16> to vector<16x8xbf16>
    %22 = vector.extract_strided_slice %16 {offsets = [0, 64], sizes = [16, 8], strides = [1, 1]} : vector<16x96xbf16> to vector<16x8xbf16>
    %cst_10 = arith.constant dense<0.000000e+00> : vector<16x16xf32>
    %23 = tpu.matmul %20, %21, %cst_10 {dimension_numbers = #tpu.dot_dimension_numbers<[1], [1], [0], [0], [0, 0, 1, 0], [], []>} : vector<16x8xbf16>, vector<16x8xbf16>, vector<16x16xf32> -> vector<16x16xf32>
    %24 = arith.addf %23, %10 : vector<16x16xf32>
    %cst_11 = arith.constant dense<0xFF800000> : vector<16xf32>
    %25 = vector.multi_reduction <maximumf>, %24, %cst_11 [1] : vector<16x16xf32> to vector<16xf32>
    %26 = vector.shape_cast %25 : vector<16xf32> to vector<16x1xf32>
    %27 = vector.broadcast %26 : vector<16x1xf32> to vector<16x16xf32>
    %28 = arith.subf %24, %27 : vector<16x16xf32>
    %29 = math.exp %28 : vector<16x16xf32>
    %cst_12 = arith.constant dense<0.000000e+00> : vector<16xf32>
    %30 = vector.multi_reduction <add>, %29, %cst_12 [1] : vector<16x16xf32> to vector<16xf32>
    %31 = vector.shape_cast %30 : vector<16xf32> to vector<16x1xf32>
    %32 = tpu.reciprocal %31 {approx = true} : vector<16x1xf32> -> vector<16x1xf32>
    %33 = vector.broadcast %32 : vector<16x1xf32> to vector<16x16xf32>
    %34 = arith.mulf %29, %33 : vector<16x16xf32>
    %35 = arith.addf %19, %34 : vector<16x16xf32>
    %36 = arith.truncf %34 : vector<16x16xf32> to vector<16x16xbf16>
    %cst_13 = arith.constant dense<0.000000e+00> : vector<16x8xf32>
    %37 = tpu.matmul %36, %22, %cst_13 {dimension_numbers = #tpu.dot_dimension_numbers<[1], [0], [0], [1], [0, 0, 1, 1], [], []>} : vector<16x16xbf16>, vector<16x8xbf16>, vector<16x8xf32> -> vector<16x8xf32>
    %38 = arith.truncf %37 : vector<16x8xf32> to vector<16x8xbf16>
    %39 = vector.extract_strided_slice %17 {offsets = [0, 0, 0], sizes = [1, 8, 32], strides = [1, 1, 1]} : vector<4x8x32xbf16> to vector<1x8x32xbf16>
    %40 = vector.shape_cast %39 : vector<1x8x32xbf16> to vector<8x32xbf16>
    %cst_14 = arith.constant dense<0.000000e+00> : vector<16x32xf32>
    %41 = tpu.matmul %38, %40, %cst_14 {dimension_numbers = #tpu.dot_dimension_numbers<[1], [0], [0], [1], [0, 0, 1, 1], [], []>} : vector<16x8xbf16>, vector<8x32xbf16>, vector<16x32xf32> -> vector<16x32xf32>
    %42 = arith.addf %18, %41 : vector<16x32xf32>
    %43 = vector.extract_strided_slice %16 {offsets = [0, 8], sizes = [16, 8], strides = [1, 1]} : vector<16x96xbf16> to vector<16x8xbf16>
    %44 = vector.extract_strided_slice %16 {offsets = [0, 40], sizes = [16, 8], strides = [1, 1]} : vector<16x96xbf16> to vector<16x8xbf16>
    %45 = vector.extract_strided_slice %16 {offsets = [0, 72], sizes = [16, 8], strides = [1, 1]} : vector<16x96xbf16> to vector<16x8xbf16>
    %cst_15 = arith.constant dense<0.000000e+00> : vector<16x16xf32>
    %46 = tpu.matmul %43, %44, %cst_15 {dimension_numbers = #tpu.dot_dimension_numbers<[1], [1], [0], [0], [0, 0, 1, 0], [], []>} : vector<16x8xbf16>, vector<16x8xbf16>, vector<16x16xf32> -> vector<16x16xf32>
    %47 = arith.addf %46, %10 : vector<16x16xf32>
    %cst_16 = arith.constant dense<0xFF800000> : vector<16xf32>
    %48 = vector.multi_reduction <maximumf>, %47, %cst_16 [1] : vector<16x16xf32> to vector<16xf32>
    %49 = vector.shape_cast %48 : vector<16xf32> to vector<16x1xf32>
    %50 = vector.broadcast %49 : vector<16x1xf32> to vector<16x16xf32>
    %51 = arith.subf %47, %50 : vector<16x16xf32>
    %52 = math.exp %51 : vector<16x16xf32>
    %cst_17 = arith.constant dense<0.000000e+00> : vector<16xf32>
    %53 = vector.multi_reduction <add>, %52, %cst_17 [1] : vector<16x16xf32> to vector<16xf32>
    %54 = vector.shape_cast %53 : vector<16xf32> to vector<16x1xf32>
    %55 = tpu.reciprocal %54 {approx = true} : vector<16x1xf32> -> vector<16x1xf32>
    %56 = vector.broadcast %55 : vector<16x1xf32> to vector<16x16xf32>
    %57 = arith.mulf %52, %56 : vector<16x16xf32>
    %58 = arith.addf %35, %57 : vector<16x16xf32>
    %59 = arith.truncf %57 : vector<16x16xf32> to vector<16x16xbf16>
    %cst_18 = arith.constant dense<0.000000e+00> : vector<16x8xf32>
    %60 = tpu.matmul %59, %45, %cst_18 {dimension_numbers = #tpu.dot_dimension_numbers<[1], [0], [0], [1], [0, 0, 1, 1], [], []>} : vector<16x16xbf16>, vector<16x8xbf16>, vector<16x8xf32> -> vector<16x8xf32>
    %61 = arith.truncf %60 : vector<16x8xf32> to vector<16x8xbf16>
    %62 = vector.extract_strided_slice %17 {offsets = [1, 0, 0], sizes = [1, 8, 32], strides = [1, 1, 1]} : vector<4x8x32xbf16> to vector<1x8x32xbf16>
    %63 = vector.shape_cast %62 : vector<1x8x32xbf16> to vector<8x32xbf16>
    %cst_19 = arith.constant dense<0.000000e+00> : vector<16x32xf32>
    %64 = tpu.matmul %61, %63, %cst_19 {dimension_numbers = #tpu.dot_dimension_numbers<[1], [0], [0], [1], [0, 0, 1, 1], [], []>} : vector<16x8xbf16>, vector<8x32xbf16>, vector<16x32xf32> -> vector<16x32xf32>
    %65 = arith.addf %42, %64 : vector<16x32xf32>
    %66 = vector.extract_strided_slice %16 {offsets = [0, 16], sizes = [16, 8], strides = [1, 1]} : vector<16x96xbf16> to vector<16x8xbf16>
    %67 = vector.extract_strided_slice %16 {offsets = [0, 48], sizes = [16, 8], strides = [1, 1]} : vector<16x96xbf16> to vector<16x8xbf16>
    %68 = vector.extract_strided_slice %16 {offsets = [0, 80], sizes = [16, 8], strides = [1, 1]} : vector<16x96xbf16> to vector<16x8xbf16>
    %cst_20 = arith.constant dense<0.000000e+00> : vector<16x16xf32>
    %69 = tpu.matmul %66, %67, %cst_20 {dimension_numbers = #tpu.dot_dimension_numbers<[1], [1], [0], [0], [0, 0, 1, 0], [], []>} : vector<16x8xbf16>, vector<16x8xbf16>, vector<16x16xf32> -> vector<16x16xf32>
    %70 = arith.addf %69, %10 : vector<16x16xf32>
    %cst_21 = arith.constant dense<0xFF800000> : vector<16xf32>
    %71 = vector.multi_reduction <maximumf>, %70, %cst_21 [1] : vector<16x16xf32> to vector<16xf32>
    %72 = vector.shape_cast %71 : vector<16xf32> to vector<16x1xf32>
    %73 = vector.broadcast %72 : vector<16x1xf32> to vector<16x16xf32>
    %74 = arith.subf %70, %73 : vector<16x16xf32>
    %75 = math.exp %74 : vector<16x16xf32>
    %cst_22 = arith.constant dense<0.000000e+00> : vector<16xf32>
    %76 = vector.multi_reduction <add>, %75, %cst_22 [1] : vector<16x16xf32> to vector<16xf32>
    %77 = vector.shape_cast %76 : vector<16xf32> to vector<16x1xf32>
    %78 = tpu.reciprocal %77 {approx = true} : vector<16x1xf32> -> vector<16x1xf32>
    %79 = vector.broadcast %78 : vector<16x1xf32> to vector<16x16xf32>
    %80 = arith.mulf %75, %79 : vector<16x16xf32>
    %81 = arith.addf %58, %80 : vector<16x16xf32>
    %82 = arith.truncf %80 : vector<16x16xf32> to vector<16x16xbf16>
    %cst_23 = arith.constant dense<0.000000e+00> : vector<16x8xf32>
    %83 = tpu.matmul %82, %68, %cst_23 {dimension_numbers = #tpu.dot_dimension_numbers<[1], [0], [0], [1], [0, 0, 1, 1], [], []>} : vector<16x16xbf16>, vector<16x8xbf16>, vector<16x8xf32> -> vector<16x8xf32>
    %84 = arith.truncf %83 : vector<16x8xf32> to vector<16x8xbf16>
    %85 = vector.extract_strided_slice %17 {offsets = [2, 0, 0], sizes = [1, 8, 32], strides = [1, 1, 1]} : vector<4x8x32xbf16> to vector<1x8x32xbf16>
    %86 = vector.shape_cast %85 : vector<1x8x32xbf16> to vector<8x32xbf16>
    %cst_24 = arith.constant dense<0.000000e+00> : vector<16x32xf32>
    %87 = tpu.matmul %84, %86, %cst_24 {dimension_numbers = #tpu.dot_dimension_numbers<[1], [0], [0], [1], [0, 0, 1, 1], [], []>} : vector<16x8xbf16>, vector<8x32xbf16>, vector<16x32xf32> -> vector<16x32xf32>
    %88 = arith.addf %65, %87 : vector<16x32xf32>
    %89 = vector.extract_strided_slice %16 {offsets = [0, 24], sizes = [16, 8], strides = [1, 1]} : vector<16x96xbf16> to vector<16x8xbf16>
    %90 = vector.extract_strided_slice %16 {offsets = [0, 56], sizes = [16, 8], strides = [1, 1]} : vector<16x96xbf16> to vector<16x8xbf16>
    %91 = vector.extract_strided_slice %16 {offsets = [0, 88], sizes = [16, 8], strides = [1, 1]} : vector<16x96xbf16> to vector<16x8xbf16>
    %cst_25 = arith.constant dense<0.000000e+00> : vector<16x16xf32>
    %92 = tpu.matmul %89, %90, %cst_25 {dimension_numbers = #tpu.dot_dimension_numbers<[1], [1], [0], [0], [0, 0, 1, 0], [], []>} : vector<16x8xbf16>, vector<16x8xbf16>, vector<16x16xf32> -> vector<16x16xf32>
    %93 = arith.addf %92, %10 : vector<16x16xf32>
    %cst_26 = arith.constant dense<0xFF800000> : vector<16xf32>
    %94 = vector.multi_reduction <maximumf>, %93, %cst_26 [1] : vector<16x16xf32> to vector<16xf32>
    %95 = vector.shape_cast %94 : vector<16xf32> to vector<16x1xf32>
    %96 = vector.broadcast %95 : vector<16x1xf32> to vector<16x16xf32>
    %97 = arith.subf %93, %96 : vector<16x16xf32>
    %98 = math.exp %97 : vector<16x16xf32>
    %cst_27 = arith.constant dense<0.000000e+00> : vector<16xf32>
    %99 = vector.multi_reduction <add>, %98, %cst_27 [1] : vector<16x16xf32> to vector<16xf32>
    %100 = vector.shape_cast %99 : vector<16xf32> to vector<16x1xf32>
    %101 = tpu.reciprocal %100 {approx = true} : vector<16x1xf32> -> vector<16x1xf32>
    %102 = vector.broadcast %101 : vector<16x1xf32> to vector<16x16xf32>
    %103 = arith.mulf %98, %102 : vector<16x16xf32>
    %104 = arith.addf %81, %103 : vector<16x16xf32>
    %105 = arith.truncf %103 : vector<16x16xf32> to vector<16x16xbf16>
    %cst_28 = arith.constant dense<0.000000e+00> : vector<16x8xf32>
    %106 = tpu.matmul %105, %91, %cst_28 {dimension_numbers = #tpu.dot_dimension_numbers<[1], [0], [0], [1], [0, 0, 1, 1], [], []>} : vector<16x16xbf16>, vector<16x8xbf16>, vector<16x8xf32> -> vector<16x8xf32>
    %107 = arith.truncf %106 : vector<16x8xf32> to vector<16x8xbf16>
    %108 = vector.extract_strided_slice %17 {offsets = [3, 0, 0], sizes = [1, 8, 32], strides = [1, 1, 1]} : vector<4x8x32xbf16> to vector<1x8x32xbf16>
    %109 = vector.shape_cast %108 : vector<1x8x32xbf16> to vector<8x32xbf16>
    %cst_29 = arith.constant dense<0.000000e+00> : vector<16x32xf32>
    %110 = tpu.matmul %107, %109, %cst_29 {dimension_numbers = #tpu.dot_dimension_numbers<[1], [0], [0], [1], [0, 0, 1, 1], [], []>} : vector<16x8xbf16>, vector<8x32xbf16>, vector<16x32xf32> -> vector<16x32xf32>
    %111 = arith.addf %88, %110 : vector<16x32xf32>
    %112 = vector.broadcast %4 : vector<1x32xf32> to vector<16x32xf32>
    %113 = arith.addf %111, %112 : vector<16x32xf32>
    %114 = arith.addf %0, %113 : vector<16x32xf32>
    %cst_30 = arith.constant dense<0.000000e+00> : vector<16xf32>
    %115 = vector.multi_reduction <add>, %114, %cst_30 [1] : vector<16x32xf32> to vector<16xf32>
    %116 = vector.shape_cast %115 : vector<16xf32> to vector<16x1xf32>
    %cst_31 = arith.constant 3.200000e+01 : f32
    %117 = vector.broadcast %cst_31 : f32 to vector<16x1xf32>
    %118 = arith.divf %116, %117 : vector<16x1xf32>
    %119 = vector.broadcast %118 : vector<16x1xf32> to vector<16x32xf32>
    %120 = arith.subf %114, %119 : vector<16x32xf32>
    %121 = arith.mulf %120, %120 : vector<16x32xf32>
    %cst_32 = arith.constant dense<0.000000e+00> : vector<16xf32>
    %122 = vector.multi_reduction <add>, %121, %cst_32 [1] : vector<16x32xf32> to vector<16xf32>
    %123 = vector.shape_cast %122 : vector<16xf32> to vector<16x1xf32>
    %cst_33 = arith.constant 3.200000e+01 : f32
    %124 = vector.broadcast %cst_33 : f32 to vector<16x1xf32>
    %125 = arith.divf %123, %124 : vector<16x1xf32>
    %126 = vector.broadcast %118 : vector<16x1xf32> to vector<16x32xf32>
    %127 = arith.subf %114, %126 : vector<16x32xf32>
    %cst_34 = arith.constant 9.99999974E-6 : f32
    %128 = vector.broadcast %cst_34 : f32 to vector<16x1xf32>
    %129 = arith.addf %125, %128 : vector<16x1xf32>
    %130 = math.rsqrt %129 : vector<16x1xf32>
    %131 = vector.broadcast %130 : vector<16x1xf32> to vector<16x32xf32>
    %132 = arith.mulf %127, %131 : vector<16x32xf32>
    %133 = vector.broadcast %6 : vector<1x32xf32> to vector<16x32xf32>
    %134 = arith.mulf %132, %133 : vector<16x32xf32>
    %135 = vector.broadcast %7 : vector<1x32xf32> to vector<16x32xf32>
    %136 = arith.addf %134, %135 : vector<16x32xf32>
    %137 = arith.truncf %136 : vector<16x32xf32> to vector<16x32xbf16>
    %c0_35 = arith.constant 0 : index
    %c0_36 = arith.constant 0 : index
    %138 = vector.load %arg3[%c0_35, %c0_36] : memref<32x64xbf16, #tpu.memory_space<vmem>>, vector<32x64xbf16>
    %cst_37 = arith.constant dense<0.000000e+00> : vector<16x64xf32>
    %139 = tpu.matmul %137, %138, %cst_37 {dimension_numbers = #tpu.dot_dimension_numbers<[1], [0], [0], [1], [0, 0, 1, 1], [], []>} : vector<16x32xbf16>, vector<32x64xbf16>, vector<16x64xf32> -> vector<16x64xf32>
    %140 = vector.broadcast %3 : vector<1x64xf32> to vector<16x64xf32>
    %141 = arith.addf %139, %140 : vector<16x64xf32>
    %cst_38 = arith.constant 0.000000e+00 : f32
    %142 = vector.broadcast %cst_38 : f32 to vector<16x64xf32>
    %143 = arith.maximumf %141, %142 : vector<16x64xf32>
    %144 = arith.truncf %143 : vector<16x64xf32> to vector<16x64xbf16>
    %c0_39 = arith.constant 0 : index
    %c0_40 = arith.constant 0 : index
    %145 = vector.load %arg4[%c0_39, %c0_40] : memref<64x32xbf16, #tpu.memory_space<vmem>>, vector<64x32xbf16>
    %cst_41 = arith.constant dense<0.000000e+00> : vector<16x32xf32>
    %146 = tpu.matmul %144, %145, %cst_41 {dimension_numbers = #tpu.dot_dimension_numbers<[1], [0], [0], [1], [0, 0, 1, 1], [], []>} : vector<16x64xbf16>, vector<64x32xbf16>, vector<16x32xf32> -> vector<16x32xf32>
    %147 = vector.broadcast %5 : vector<1x32xf32> to vector<16x32xf32>
    %148 = arith.addf %146, %147 : vector<16x32xf32>
    %149 = arith.addf %136, %148 : vector<16x32xf32>
    %cst_42 = arith.constant dense<0.000000e+00> : vector<16xf32>
    %150 = vector.multi_reduction <add>, %149, %cst_42 [1] : vector<16x32xf32> to vector<16xf32>
    %151 = vector.shape_cast %150 : vector<16xf32> to vector<16x1xf32>
    %cst_43 = arith.constant 3.200000e+01 : f32
    %152 = vector.broadcast %cst_43 : f32 to vector<16x1xf32>
    %153 = arith.divf %151, %152 : vector<16x1xf32>
    %154 = vector.broadcast %153 : vector<16x1xf32> to vector<16x32xf32>
    %155 = arith.subf %149, %154 : vector<16x32xf32>
    %156 = arith.mulf %155, %155 : vector<16x32xf32>
    %cst_44 = arith.constant dense<0.000000e+00> : vector<16xf32>
    %157 = vector.multi_reduction <add>, %156, %cst_44 [1] : vector<16x32xf32> to vector<16xf32>
    %158 = vector.shape_cast %157 : vector<16xf32> to vector<16x1xf32>
    %cst_45 = arith.constant 3.200000e+01 : f32
    %159 = vector.broadcast %cst_45 : f32 to vector<16x1xf32>
    %160 = arith.divf %158, %159 : vector<16x1xf32>
    %161 = vector.broadcast %153 : vector<16x1xf32> to vector<16x32xf32>
    %162 = arith.subf %149, %161 : vector<16x32xf32>
    %cst_46 = arith.constant 9.99999974E-6 : f32
    %163 = vector.broadcast %cst_46 : f32 to vector<16x1xf32>
    %164 = arith.addf %160, %163 : vector<16x1xf32>
    %165 = math.rsqrt %164 : vector<16x1xf32>
    %166 = vector.broadcast %165 : vector<16x1xf32> to vector<16x32xf32>
    %167 = arith.mulf %162, %166 : vector<16x32xf32>
    %168 = vector.broadcast %8 : vector<1x32xf32> to vector<16x32xf32>
    %169 = arith.mulf %167, %168 : vector<16x32xf32>
    %170 = vector.broadcast %9 : vector<1x32xf32> to vector<16x32xf32>
    %171 = arith.addf %169, %170 : vector<16x32xf32>
    %c0_47 = arith.constant 0 : index
    %c0_48 = arith.constant 0 : index
    %172 = vector.load %arg6[%c0_47, %c0_48] : memref<16x32xf32, #tpu.memory_space<vmem>>, vector<16x32xf32>
    tpu.vector_store %arg6[%c0_47, %c0_48], %171 {strides = array<i32>} : memref<16x32xf32, #tpu.memory_space<vmem>>, vector<16x32xf32>,
    %173 = vector.extract_strided_slice %1 {offsets = [8, 16], sizes = [8, 16], strides = [1, 1]} : vector<24x128xf32> to vector<8x16xf32>
    %174 = vector.extract_strided_slice %1 {offsets = [8, 32], sizes = [16, 8], strides = [1, 1]} : vector<24x128xf32> to vector<16x8xf32>
    %cst_49 = arith.constant dense<0.000000e+00> : vector<16x8xf32>
    %175 = tpu.matmul %104, %174, %cst_49 {dimension_numbers = #tpu.dot_dimension_numbers<[1], [0], [0], [1], [0, 0, 1, 1], [], []>} : vector<16x16xf32>, vector<16x8xf32>, vector<16x8xf32> -> vector<16x8xf32>
    %cst_50 = arith.constant dense<0.000000e+00> : vector<8x8xf32>
    %176 = tpu.matmul %173, %175, %cst_50 {dimension_numbers = #tpu.dot_dimension_numbers<[1], [0], [0], [1], [0, 0, 1, 1], [], []>} : vector<8x16xf32>, vector<16x8xf32>, vector<8x8xf32> -> vector<8x8xf32>
    %177 = vector.extract_strided_slice %1 {offsets = [16, 16], sizes = [8, 16], strides = [1, 1]} : vector<24x128xf32> to vector<8x16xf32>
    %178 = vector.extract_strided_slice %1 {offsets = [8, 40], sizes = [16, 8], strides = [1, 1]} : vector<24x128xf32> to vector<16x8xf32>
    %cst_51 = arith.constant dense<0.000000e+00> : vector<16x8xf32>
    %179 = tpu.matmul %104, %178, %cst_51 {dimension_numbers = #tpu.dot_dimension_numbers<[1], [0], [0], [1], [0, 0, 1, 1], [], []>} : vector<16x16xf32>, vector<16x8xf32>, vector<16x8xf32> -> vector<16x8xf32>
    %cst_52 = arith.constant dense<0.000000e+00> : vector<8x8xf32>
    %180 = tpu.matmul %177, %179, %cst_52 {dimension_numbers = #tpu.dot_dimension_numbers<[1], [0], [0], [1], [0, 0, 1, 1], [], []>} : vector<8x16xf32>, vector<16x8xf32>, vector<8x8xf32> -> vector<8x8xf32>
    %181 = tpu.concatenate %176, %180 in 0 : vector<8x8xf32>, vector<8x8xf32> -> vector<16x8xf32>
    %c0_53 = arith.constant 0 : index
    %c0_54 = arith.constant 0 : index
    %182 = vector.load %arg7[%c0_53, %c0_54] : memref<16x8xf32, #tpu.memory_space<vmem>>, vector<16x8xf32>
    tpu.vector_store %arg7[%c0_53, %c0_54], %181 {strides = array<i32>} : memref<16x8xf32, #tpu.memory_space<vmem>>, vector<16x8xf32>,
    return
  }
}

</mosaic_0001>

<bundles_post_ra>
// kernel: encoder_layer.1
= control target key start
LH: loop header
LB: loop body
LE: loop exit
PB: predicated region body
PF: predicated region fallthrough
CT: control target
= control target key end

     0   :  { %13 = vsyncpa [#allocation3], 0  ;;  %s2163_s0 = inlined_call_operand.vmem [shape: f32[16,32], index: 0, kind: input, shape index: {}]   ;;  %s2164_s1 = inlined_call_operand.vmem [shape: bf16[32,96], index: 1, kind: input, shape index: {}]   ;;  %s2165_s2 = inlined_call_operand.hbm [shape: bf16[4,8,32], index: 2, kind: input, shape index: {}]   ;;  %s2166_s3 = inlined_call_operand.hbm [shape: bf16[32,64], index: 3, kind: input, shape index: {}]   ;;  %s2167_s4 = inlined_call_operand.vmem [shape: bf16[64,32], index: 4, kind: input, shape index: {}]   ;;  %s2168_s5 = inlined_call_operand.vmem [shape: f32[24,128], index: 5, kind: input, shape index: {}]   ;;  %s2169_s6 = inlined_call_operand.hbm [shape: f32[16,32], index: 6, kind: output, shape index: {0}]   ;;  %s2170_s7 = inlined_call_operand.hbm [shape: f32[16,8], index: 7, kind: output, shape index: {1}]  }
   0x1   :  { %14 = vsyncpa [#allocation6], 0 }
   0x2   :  { %15 = vsyncpa [#allocation4], 0 }
   0x3   :  { %16 = vsyncpa [#allocation9], 0  ;;  %s1809_s24 = smov [#allocation2]   ;;  %s1713_s28 = scalar_lea.hbm %s2165_s2, 256 }
   0x4   :  { %s26_s25 = sshll.u32 %s1809_s24, 4  ;;  %p1714_p0 = scmp.ne.s32.totalorder %s2165_s2, %s1713_s28  ;;  %s27_s25 = int_to_ptr.vmem [resolvable:$true] %s26_s25 }
   0x5   :  { %p1717_p1 = scmp.lt.u32.totalorder %s1713_s28, %s2165_s2 }
   0x7   :  { %p1719_p2 = pnand %p1717_p1, %p1714_p0 }
   0x9   :  { %1722 = shalt.err (!%p1719_p2)
}
   0xa   :  { %s1723_s10 = scalar_lea.vmem %s27_s25, 256  ;;  %p1728_p4 = scmp.lt.s32.totalorder %s27_s25, %s27_s25 }
   0xb   :  { %p1724_p3 = scmp.ne.s32.totalorder %s27_s25, %s1723_s10  ;;  %p1729_p5 = scmp.lt.s32.totalorder %s1723_s10, %s1723_s10 }
   0xd   :  { %p1730_p6 = por %p1729_p5, %p1728_p4 }
   0xf   :  { %p1731_p7 = pnand %p1730_p6, %p1724_p3 }
  0x11   :  { %1734 = shalt.err (!%p1731_p7)
}
  0x12   :  { %s1810_s11 = smov 64   ;;  %s1811_s12 = smov 4  }
  0x13   :  { %32 = dma.hbm_to_vmem [thread:$0]  %s2165_s2, 256, %s27_s25, [#allocation3], %s1810_s11, %s1810_s11, %s1811_s12  }
  0x14   :  { %s1812_s15 = smov [#allocation5]   ;;  %s1735_s19 = scalar_lea.hbm %s2166_s3, 256 }
  0x15   :  { %s38_s16 = sshll.u32 %s1812_s15, 4  ;;  %p1736_p8 = scmp.ne.s32.totalorder %s2166_s3, %s1735_s19  ;;  %s39_s16 = int_to_ptr.vmem [resolvable:$true] %s38_s16 }
  0x16   :  { %p1739_p9 = scmp.lt.u32.totalorder %s1735_s19, %s2166_s3 }
  0x18   :  { %p1741_p10 = pnand %p1739_p9, %p1736_p8 }
  0x1a   :  { %1744 = shalt.err (!%p1741_p10)
}
  0x1b   :  { %s1745_s24 = scalar_lea.vmem %s39_s16, 256  ;;  %p1750_p12 = scmp.lt.s32.totalorder %s39_s16, %s39_s16 }
  0x1c   :  { %p1746_p11 = scmp.ne.s32.totalorder %s39_s16, %s1745_s24  ;;  %p1751_p13 = scmp.lt.s32.totalorder %s1745_s24, %s1745_s24 }
  0x1e   :  { %p1752_p0 = por %p1751_p13, %p1750_p12 }
  0x20   :  { %p1753_p1 = pnand %p1752_p0, %p1746_p11 }
  0x22   :  { %1756 = shalt.err (!%p1753_p1)
}
  0x23   :  { %44 = dma.hbm_to_vmem [thread:$0]  %s2166_s3, 256, %s39_s16, [#allocation6], %s1810_s11, %s1810_s11, %s1811_s12  }
  0x24   :  { %1801 = dma.done.wait [#allocation3], 256  }
  0x25   :  { %1802 = vsyncadd [#allocation3], 4294967040 }
  0x26   :  { %1803 = dma.done.wait [#allocation6], 256  }
  0x27   :  { %1804 = vsyncadd [#allocation6], 4294967040  ;;  %v1813_v0 = vmov 0.0   ;;  %vm1814_vm0 = vmmov 0   ;;  %v1665_v1 = vld [vmem:[%s2164_s1] sm:$0xff]   ;;  %v1666_v2 = vld [vmem:[%s2164_s1 + $0x8] sm:$0xff]   ;;  %v66_v6 = vlaneseq }
  0x28   :  { %1492 = vmatprep.subr.bf16.mxu0 %v1813_v0  ;;  %1496 = vmatprep.mubr.msk.bf16.mxu0 %vm1814_vm0, %v1813_v0  ;;  %v1913_v3 = vld [vmem:[%s2163_s0] sm:$0xff]  ;;  %v1918_v4 = vld [vmem:[%s2163_s0 + $0x8] sm:$0xff]  ;;  %vm82_vm1 = vcmask 261120   ;;  %s1815_s10 = smov 120   ;;  %s1816_s12 = smov 96   ;;  %vm135_vm2 = vcmask 64512  }
  0x29   :  { %1500 = vmatprep.subr.bf16.mxu1 %v1813_v0  ;;  %1502 = vmatprep.mubr.msk.bf16.mxu1 %vm1814_vm0, %v1813_v0  ;;  %v61_v5 = vpack.c.bf16 %v1918_v4, %v1913_v3  ;;  %v1927_v7 = vshrl.u32 %v66_v6, 7  ;;  %v1933_v9 = vld [vmem:[%s2168_s5] sm:$0xff]  ;;  %s1817_s13 = smov 88   ;;  %v1957_v23 = vld [vmem:[%s2168_s5 + $0x8] sm:$0xff]  ;;  %v1962_v25 = vld [vmem:[%s2168_s5 + $0x10] sm:$0xff]  ;;  %vm183_vm3 = vcmask 130048  }
  0x2a   :  { %1493 = vmatpush3.bf16.msra.mxu0 %v1665_v1  ;;  %s1818_s5 = smov 56   ;;  %s1819_s18 = smov 80   ;;  %vm384_vm4 = vcmask 1043456   ;;  %vm973_vm5 = vcmask 523264  }
  0x2b   :  { %1494 = vmatprep.subr.bf16.mxu0 %v1813_v0  ;;  %v68_v8 = vsub.s32 0, %v1927_v7  ;;  %s1820_s19 = smov 112   ;;  %s1822_s20 = smov 48  }
  0x2c   :  { %s1823_s21 = smov 104   ;;  %s1824_s22 = smov 40  }
  0x2d   :  { %v69_v10 = vrot.slane %v1933_v9, %v68_v8 }
  0x2e   :  { %1495 = vmatpush3.bf16.msra.mxu0 %v1666_v2 }
  0x2f   :  { %1506 = vmatprep.subr.bf16.mxu0 %v1813_v0 }
  0x31   :  { %1497 = vmatmul.mubr.msk.bf16.vlgmr.msra.gmra.mrb[0].mxu0 %vm82_vm1, %v61_v5 }
  0x32   :  { %1508 = vmatprep.mubr.msk.bf16.mxu0 %vm1814_vm0, %v1813_v0 }
 0x104   :  { %v120_v11 = vpop.f32.mrb[0].mxu0 }
 0x105   :  { %v1498_v12 = vpop.f32.mrb[1].mxu0  ;;  %v121_v14 = vadd.f32 %v120_v11, %v69_v10 }
 0x106   :  { %v123_v13 = vpop.f32.mrb[2].mxu0 }
 0x107   :  { %v124_v15 = vadd.f32 %v123_v13, %v69_v10  ;;  %v1499_v16 = vpop.f32.mrb[3].mxu0 }
 0x109   :  { %v1936_v17 = vpack.c.bf16 %v124_v15, %v121_v14 }
 0x10b   :  { %257 = vrot.lane.b32.xlu1 %v1936_v17, %s1815_s10  ;;  %133 = vrot.lane.b32.xlu0 %v1936_v17, %s1816_s12 }
 0x10f   :  { %259 = vrot.lane.b32.xlu0 %v1936_v17, %s1817_s13 }
 0x17d   :  { %v134_v18 = vpop.permute.xlu0 %133  ;;  %v258_v22 = vpop.permute.xlu1 %257 }
 0x17e   :  { %v140_v19 = vsel %vm135_vm2, %v134_v18, 0 }
 0x17f   :  { %1501 = vmatpush3.bf16.xpose.msra.mxu1 %v140_v19 }
 0x180   :  { %1512 = vmatprep.subr.bf16.mxu1 %v1813_v0 }
 0x181   :  { %v260_v20 = vpop.permute.xlu0 %259 }
 0x182   :  { %v265_v21 = vsel %vm135_vm2, %v260_v20, 0 }
 0x186   :  { %1503 = vmatmul.mubr.msk.bf16.vlgmr.msra.gmra.mrb[0].mxu1 %vm135_vm2, %v1936_v17 }
 0x187   :  { %1513 = vmatpush3.bf16.xpose.msra.mxu1 %v265_v21  ;;  %1514 = vmatprep.mubr.msk.bf16.mxu1 %vm1814_vm0, %v1813_v0  ;;  %v128_v21 = vld [vmem:[#allocation2] sm:$0xf] }
 0x188   :  { %1524 = vmatprep.subr.bf16.mxu1 %v1813_v0 }
 0x18e   :  { %1515 = vmatmul.mubr.msk.bf16.vlgmr.msra.gmra.mrb[4].mxu1 %vm135_vm2, %v258_v22  ;;  %v433_v22 = vsel %vm384_vm4, %v128_v21, 0 }
 0x18f   :  { %1526 = vmatprep.mubr.msk.bf16.mxu1 %vm1814_vm0, %v1813_v0 }
 0x259   :  { %v176_v24 = vpop.f32.mrb[0].mxu1 }
 0x25a   :  { %v177_v26 = vadd.f32 %v176_v24, %v1957_v23  ;;  %v1504_v27 = vpop.f32.mrb[1].mxu1  ;;  %v129_v24 = vld [vmem:[#allocation2 + $0x4] sm:$0xf] }
 0x25b   :  { %v179_v28 = vpop.f32.mrb[2].mxu1 }
 0x25c   :  { %v180_v29 = vadd.f32 %v179_v28, %v1962_v25  ;;  %v1505_v30 = vpop.f32.mrb[3].mxu1  ;;  %v184_v31 = vsel %vm183_vm3, %v177_v26, -inf }
 0x25d   :  { %185 = vmax.xlane.f32.xlu1 %v184_v31 }
 0x25e   :  { %v187_v32 = vsel %vm183_vm3, %v180_v29, -inf }
 0x25f   :  { %188 = vmax.xlane.f32.xlu0 %v187_v32 }
 0x261   :  { %v301_v33 = vpop.f32.mrb[4].mxu1 }
 0x262   :  { %v302_v34 = vadd.f32 %v301_v33, %v1957_v23  ;;  %v1516_v35 = vpop.f32.mrb[5].mxu1 }
 0x263   :  { %v304_v36 = vpop.f32.mrb[6].mxu1 }
 0x264   :  { %v305_v37 = vadd.f32 %v304_v36, %v1962_v25  ;;  %v1517_v38 = vpop.f32.mrb[7].mxu1  ;;  %v308_v39 = vsel %vm183_vm3, %v302_v34, -inf }
 0x265   :  { %309 = vmax.xlane.f32.xlu0 %v308_v39 }
 0x266   :  { %v311_v40 = vsel %vm183_vm3, %v305_v37, -inf }
 0x267   :  { %312 = vmax.xlane.f32.xlu1 %v311_v40 }
 0x2ea   :  { %v186_v41 = vpop.xlane.xlu1 %185 }
 0x2eb   :  { %v190_v42 = vsub.f32 %v177_v26, %v186_v41  ;;  %v386_v26 = vsel %vm384_vm4, %v129_v24, 0 }
 0x2ec   :  { %v189_v43 = vpop.xlane.xlu0 %188  ;;  %1525 = vmatpush3.bf16.msra.mxu1 %v386_v26 }
 0x2ed   :  { %v192_v44 = vmul.f32 1.442695, %v190_v42  ;;  %v191_v45 = vsub.f32 %v180_v29, %v189_v43  ;;  %1536 = vmatprep.subr.bf16.mxu1 %v1813_v0 }
 0x2ef   :  { %1673 = vpow2.f32 %v192_v44  ;;  %v194_v46 = vmul.f32 1.442695, %v191_v45 }
 0x2f1   :  { %1675 = vpow2.f32 %v194_v46 }
 0x2f2   :  { %v310_v47 = vpop.xlane.xlu0 %309 }
 0x2f3   :  { %v314_v48 = vsub.f32 %v302_v34, %v310_v47 }
 0x2f4   :  { %v313_v49 = vpop.xlane.xlu1 %312 }
 0x2f5   :  { %v316_v50 = vmul.f32 1.442695, %v314_v48  ;;  %v315_v51 = vsub.f32 %v305_v37, %v313_v49 }
 0x2f7   :  { %1677 = vpow2.f32 %v316_v50  ;;  %v318_v52 = vmul.f32 1.442695, %v315_v51 }
 0x2f9   :  { %v1674_v53 = vpop.eup %1673  ;;  %1679 = vpow2.f32 %v318_v52 }
 0x2fa   :  { %v196_v54 = vsel %vm183_vm3, %v1674_v53, 0.0 }
 0x2fb   :  { %v1676_v55 = vpop.eup %1675  ;;  %197 = vadd.xlane.f32.xlu0 %v196_v54 }
 0x2fc   :  { %v199_v56 = vsel %vm183_vm3, %v1676_v55, 0.0 }
 0x2fd   :  { %200 = vadd.xlane.f32.xlu1 %v199_v56 }
 0x301   :  { %v1678_v57 = vpop.eup %1677 }
 0x302   :  { %v320_v58 = vsel %vm183_vm3, %v1678_v57, 0.0 }
 0x303   :  { %v1680_v59 = vpop.eup %1679  ;;  %321 = vadd.xlane.f32.xlu0 %v320_v58 }
 0x304   :  { %v323_v60 = vsel %vm183_vm3, %v1680_v59, 0.0 }
 0x305   :  { %324 = vadd.xlane.f32.xlu1 %v323_v60 }
 0x316   :  { %333 = vrot.lane.b32.xlu1 %v1936_v17, %s1818_s5 }
 0x319   :  { %209 = vrot.lane.b32.xlu0 %v1936_v17, %s1810_s11  ;;  %s1821_s11 = smov 72  }
 0x31a   :  { %478 = vrot.lane.b32.xlu1 %v1936_v17, %s1819_s18 }
 0x31d   :  { %476 = vrot.lane.b32.xlu0 %v1936_v17, %s1820_s19 }
 0x388   :  { %v198_v61 = vpop.xlane.xlu0 %197 }
 0x389   :  { %1681 = vrcp.f32 %v198_v61 }
 0x38a   :  { %v201_v62 = vpop.xlane.xlu1 %200 }
 0x38b   :  { %1683 = vrcp.f32 %v201_v62 }
 0x390   :  { %v322_v63 = vpop.xlane.xlu0 %321 }
 0x391   :  { %1685 = vrcp.f32 %v322_v63 }
 0x392   :  { %v325_v1 = vpop.xlane.xlu1 %324 }
 0x393   :  { %v1682_v2 = vpop.eup %1681  ;;  %1687 = vrcp.f32 %v325_v1 }
 0x394   :  { %v210_v5 = vpop.permute.xlu0 %209  ;;  %v204_v8 = vmul.f32 %v1682_v2, %v1674_v53 }
 0x395   :  { %v1684_v6 = vpop.eup %1683  ;;  %1507 = vmatpush3.bf16.msra.mxu0 %v210_v5 }
 0x396   :  { %v205_v10 = vmul.f32 %v1684_v6, %v1676_v55  ;;  %1518 = vmatprep.subr.bf16.mxu0 %v1813_v0  ;;  %v334_v12 = vpop.permute.xlu1 %333 }
 0x398   :  { %v208_v11 = vpack.c.bf16 %v205_v10, %v204_v8  ;;  %v477_v39 = vpop.permute.xlu0 %476 }
 0x39a   :  { %1509 = vmatmul.mubr.msk.bf16.vlgmr.msra.gmra.mrb[4].mxu0 %vm183_vm3, %v208_v11  ;;  %v479_v34 = vpop.permute.xlu1 %478 }
 0x39b   :  { %v1686_v13 = vpop.eup %1685  ;;  %1519 = vmatpush3.bf16.msra.mxu0 %v334_v12  ;;  %1520 = vmatprep.mubr.msk.bf16.mxu0 %vm1814_vm0, %v1813_v0  ;;  %v484_v38 = vsel %vm135_vm2, %v479_v34, 0 }
 0x39c   :  { %v328_v14 = vmul.f32 %v1686_v13, %v1678_v57  ;;  %1530 = vmatprep.subr.bf16.mxu0 %v1813_v0 }
 0x39d   :  { %v1688_v15 = vpop.eup %1687 }
 0x39e   :  { %v329_v16 = vmul.f32 %v1688_v15, %v1680_v59  ;;  %v1987_v18 = vadd.f32 %v328_v14, %v204_v8 }
 0x3a0   :  { %v1989_v19 = vadd.f32 %v329_v16, %v205_v10  ;;  %v332_v20 = vpack.c.bf16 %v329_v16, %v328_v14 }
 0x3a2   :  { %1521 = vmatmul.mubr.msk.bf16.vlgmr.msra.gmra.mrb[8].mxu0 %vm183_vm3, %v332_v20 }
 0x3a3   :  { %1532 = vmatprep.mubr.msk.bf16.mxu0 %vm1814_vm0, %v1813_v0  ;;  %1531 = vmatpush3.bf16.msra.mxu0 %v433_v22 }
 0x3a4   :  { %1542 = vmatprep.subr.bf16.mxu0 %v1813_v0 }
 0x46d   :  { %v249_v27 = vpop.f32.mrb[4].mxu0 }
 0x46e   :  { %v1510_v28 = vpop.f32.mrb[5].mxu0 }
 0x46f   :  { %v252_v29 = vpop.f32.mrb[6].mxu0 }
 0x470   :  { %v256_v30 = vpack.c.bf16 %v252_v29, %v249_v27  ;;  %v1511_v31 = vpop.f32.mrb[7].mxu0 }
 0x472   :  { %1533 = vmatmul.mubr.msk.bf16.vlgmr.msra.gmra.mrb[12].mxu0 %vm135_vm2, %v256_v30 }
 0x473   :  { %1544 = vmatprep.mubr.msk.bf16.mxu0 %vm1814_vm0, %v1813_v0 }
 0x475   :  { %v373_v32 = vpop.f32.mrb[8].mxu0 }
 0x476   :  { %v1522_v33 = vpop.f32.mrb[9].mxu0 }
 0x477   :  { %v376_v35 = vpop.f32.mrb[10].mxu0 }
 0x478   :  { %v380_v36 = vpack.c.bf16 %v376_v35, %v373_v32  ;;  %v1523_v37 = vpop.f32.mrb[11].mxu0 }
 0x47a   :  { %1527 = vmatmul.mubr.msk.bf16.vlgmr.msra.gmra.mrb[8].mxu1 %vm135_vm2, %v380_v36 }
 0x47b   :  { %1537 = vmatpush3.bf16.xpose.msra.mxu1 %v484_v38  ;;  %1538 = vmatprep.mubr.msk.bf16.mxu1 %vm1814_vm0, %v1813_v0 }
 0x47c   :  { %1548 = vmatprep.subr.bf16.mxu1 %v1813_v0 }
 0x482   :  { %1539 = vmatmul.mubr.msk.bf16.vlgmr.msra.gmra.mrb[12].mxu1 %vm135_vm2, %v477_v39 }
 0x483   :  { %1550 = vmatprep.mubr.msk.bf16.mxu1 %vm1814_vm0, %v1813_v0 }
 0x545   :  { %v469_v40 = vpop.f32.mrb[12].mxu0 }
 0x546   :  { %v1534_v41 = vpop.f32.mrb[13].mxu0 }
 0x547   :  { %v472_v42 = vpop.f32.mrb[14].mxu0 }
 0x548   :  { %v1535_v43 = vpop.f32.mrb[15].mxu0 }
 0x54d   :  { %v422_v44 = vpop.f32.mrb[8].mxu1 }
 0x54e   :  { %v2009_v45 = vadd.f32 %v469_v40, %v422_v44  ;;  %v1528_v46 = vpop.f32.mrb[9].mxu1 }
 0x54f   :  { %v425_v47 = vpop.f32.mrb[10].mxu1 }
 0x550   :  { %v2011_v48 = vadd.f32 %v472_v42, %v425_v47  ;;  %v1529_v49 = vpop.f32.mrb[11].mxu1 }
 0x555   :  { %v520_v50 = vpop.f32.mrb[12].mxu1 }
 0x556   :  { %v521_v51 = vadd.f32 %v520_v50, %v1957_v23  ;;  %v1540_v52 = vpop.f32.mrb[13].mxu1 }
 0x557   :  { %v523_v53 = vpop.f32.mrb[14].mxu1 }
 0x558   :  { %v524_v54 = vadd.f32 %v523_v53, %v1962_v25  ;;  %v1541_v55 = vpop.f32.mrb[15].mxu1  ;;  %v527_v56 = vsel %vm183_vm3, %v521_v51, -inf }
 0x559   :  { %528 = vmax.xlane.f32.xlu1 %v527_v56 }
 0x55a   :  { %v530_v57 = vsel %vm183_vm3, %v524_v54, -inf }
 0x55b   :  { %531 = vmax.xlane.f32.xlu0 %v530_v57 }
 0x5e6   :  { %v529_v58 = vpop.xlane.xlu1 %528 }
 0x5e7   :  { %v533_v59 = vsub.f32 %v521_v51, %v529_v58 }
 0x5e8   :  { %v532_v60 = vpop.xlane.xlu0 %531 }
 0x5e9   :  { %v535_v61 = vmul.f32 1.442695, %v533_v59  ;;  %v534_v62 = vsub.f32 %v524_v54, %v532_v60 }
 0x5eb   :  { %1689 = vpow2.f32 %v535_v61  ;;  %v537_v63 = vmul.f32 1.442695, %v534_v62 }
 0x5ed   :  { %1691 = vpow2.f32 %v537_v63 }
 0x5f5   :  { %v1690_v1 = vpop.eup %1689 }
 0x5f6   :  { %v539_v2 = vsel %vm183_vm3, %v1690_v1, 0.0 }
 0x5f7   :  { %v1692_v5 = vpop.eup %1691  ;;  %540 = vadd.xlane.f32.xlu0 %v539_v2 }
 0x5f8   :  { %v542_v6 = vsel %vm183_vm3, %v1692_v5, 0.0 }
 0x5f9   :  { %543 = vadd.xlane.f32.xlu1 %v542_v6 }
 0x60a   :  { %651 = vrot.lane.b32.xlu1 %v1936_v17, %s1821_s11 }
 0x60d   :  { %552 = vrot.lane.b32.xlu0 %v1936_v17, %s1822_s20 }
 0x60e   :  { %649 = vrot.lane.b32.xlu1 %v1936_v17, %s1823_s21 }
 0x684   :  { %v541_v8 = vpop.xlane.xlu0 %540 }
 0x685   :  { %1693 = vrcp.f32 %v541_v8 }
 0x686   :  { %v544_v10 = vpop.xlane.xlu1 %543 }
 0x687   :  { %1695 = vrcp.f32 %v544_v10 }
 0x688   :  { %v553_v11 = vpop.permute.xlu0 %552 }
 0x689   :  { %1543 = vmatpush3.bf16.msra.mxu0 %v553_v11 }
 0x68a   :  { %1554 = vmatprep.subr.bf16.mxu0 %v1813_v0  ;;  %v652_v20 = vpop.permute.xlu1 %651 }
 0x68b   :  { %v657_v24 = vsel %vm135_vm2, %v652_v20, 0 }
 0x68e   :  { %v650_v26 = vpop.permute.xlu1 %649 }
 0x68f   :  { %v1694_v12 = vpop.eup %1693 }
 0x690   :  { %v547_v13 = vmul.f32 %v1694_v12, %v1690_v1 }
 0x691   :  { %v1696_v14 = vpop.eup %1695 }
 0x692   :  { %v548_v15 = vmul.f32 %v1696_v14, %v1692_v5  ;;  %v2024_v16 = vadd.f32 %v547_v13, %v1987_v18  ;;  %v130_v18 = vld [vmem:[#allocation2 + $0x8] sm:$0xf] }
 0x694   :  { %v2027_v21 = vadd.f32 %v548_v15, %v1989_v19  ;;  %v551_v22 = vpack.c.bf16 %v548_v15, %v547_v13  ;;  %v604_v19 = vsel %vm384_vm4, %v130_v18, 0  ;;  %v824_v13 = vsub.s32 2, %v1927_v7 }
 0x695   :  { %1549 = vmatpush3.bf16.msra.mxu1 %v604_v19 }
 0x696   :  { %1545 = vmatmul.mubr.msk.bf16.vlgmr.msra.gmra.mrb[16].mxu0 %vm183_vm3, %v551_v22  ;;  %1560 = vmatprep.subr.bf16.mxu1 %v1813_v0  ;;  %v825_v14 = vrot.slane %v1933_v9, %v824_v13 }
 0x697   :  { %1555 = vmatpush3.bf16.xpose.msra.mxu0 %v657_v24  ;;  %1556 = vmatprep.mubr.msk.bf16.mxu0 %vm1814_vm0, %v1813_v0 }
 0x698   :  { %1566 = vmatprep.subr.bf16.mxu0 %v1813_v0 }
 0x69e   :  { %1557 = vmatmul.mubr.msk.bf16.vlgmr.msra.gmra.mrb[20].mxu0 %vm135_vm2, %v650_v26 }
 0x69f   :  { %1568 = vmatprep.mubr.msk.bf16.mxu0 %vm1814_vm0, %v1813_v0 }
 0x769   :  { %v592_v27 = vpop.f32.mrb[16].mxu0 }
 0x76a   :  { %v1546_v28 = vpop.f32.mrb[17].mxu0 }
 0x76b   :  { %v595_v29 = vpop.f32.mrb[18].mxu0 }
 0x76c   :  { %v599_v30 = vpack.c.bf16 %v595_v29, %v592_v27  ;;  %v1547_v31 = vpop.f32.mrb[19].mxu0 }
 0x76e   :  { %1551 = vmatmul.mubr.msk.bf16.vlgmr.msra.gmra.mrb[16].mxu1 %vm135_vm2, %v599_v30  ;;  %v1655_v30 = vpack.i.bf16 %v1962_v25, %v1957_v23 }
 0x76f   :  { %1562 = vmatprep.mubr.msk.bf16.mxu1 %vm1814_vm0, %v1813_v0 }
 0x771   :  { %v693_v32 = vpop.f32.mrb[20].mxu0 }
 0x772   :  { %v694_v33 = vadd.f32 %v693_v32, %v1957_v23  ;;  %v1558_v34 = vpop.f32.mrb[21].mxu0 }
 0x773   :  { %v696_v35 = vpop.f32.mrb[22].mxu0 }
 0x774   :  { %v697_v36 = vadd.f32 %v696_v35, %v1962_v25  ;;  %v1559_v37 = vpop.f32.mrb[23].mxu0  ;;  %v700_v38 = vsel %vm183_vm3, %v694_v33, -inf }
 0x775   :  { %701 = vmax.xlane.f32.xlu0 %v700_v38 }
 0x776   :  { %v703_v39 = vsel %vm183_vm3, %v697_v36, -inf }
 0x777   :  { %704 = vmax.xlane.f32.xlu1 %v703_v39  ;;  %v1667_v39 = vld [vmem:[#allocation5] sm:$0xff]  }
 0x788   :  { %725 = vrot.lane.b32.xlu1 %v1936_v17, %s1824_s22 }
 0x78c   :  { %1656 = vrot.lane.b32.xlu1 %v1655_v30, %s1816_s12 }
 0x790   :  { %1149 = vrot.lane.b32.xlu1 %v1957_v23, %s1820_s19  ;;  %v1668_v23 = vld [vmem:[#allocation5 + $0x8] sm:$0xff]  }
 0x794   :  { %1304 = vrot.lane.b32.xlu1 %v1962_v25, %s1820_s19 }
 0x802   :  { %v702_v40 = vpop.xlane.xlu0 %701 }
 0x803   :  { %v706_v41 = vsub.f32 %v694_v33, %v702_v40 }
 0x804   :  { %v705_v42 = vpop.xlane.xlu1 %704 }
 0x805   :  { %v708_v43 = vmul.f32 1.442695, %v706_v41  ;;  %v707_v44 = vsub.f32 %v697_v36, %v705_v42 }
 0x807   :  { %1697 = vpow2.f32 %v708_v43  ;;  %v710_v46 = vmul.f32 1.442695, %v707_v44  ;;  %v1669_v43 = vld [vmem:[%s2167_s4] sm:$0xff]   ;;  %v1670_v44 = vld [vmem:[%s2167_s4 + $0x8] sm:$0xff]  }
 0x808   :  { %v726_v47 = vpop.permute.xlu1 %725 }
 0x809   :  { %1699 = vpow2.f32 %v710_v46  ;;  %1561 = vmatpush3.bf16.msra.mxu1 %v726_v47 }
 0x80a   :  { %1572 = vmatprep.subr.bf16.mxu1 %v1813_v0 }
 0x80c   :  { %v1657_v40 = vpop.permute.xlu1 %1656 }
 0x80d   :  { %v1659_v25 = vunpack.i.h.bf16 %v1657_v40  ;;  %v1658_v41 = vunpack.i.l.bf16 %v1657_v40 }
 0x80f   :  { %v1620_v42 = vpack.c.bf16 %v1659_v25, %v1658_v41 }
 0x811   :  { %v1698_v49 = vpop.eup %1697 }
 0x812   :  { %v712_v50 = vsel %vm183_vm3, %v1698_v49, 0.0 }
 0x813   :  { %v1700_v51 = vpop.eup %1699  ;;  %713 = vadd.xlane.f32.xlu0 %v712_v50 }
 0x814   :  { %v715_v52 = vsel %vm183_vm3, %v1700_v51, 0.0 }
 0x817   :  { %716 = vadd.xlane.f32.xlu0 %v715_v52 }
 0x841   :  { %v640_v17 = vpop.f32.mrb[16].mxu1 }
 0x842   :  { %v647_v53 = vadd.f32 %v640_v17, %v2009_v45  ;;  %v1552_v54 = vpop.f32.mrb[17].mxu1  ;;  %v131_v45 = vld [vmem:[#allocation2 + $0xc] sm:$0xf]  ;;  %v859_v17 = vsub.s32 4, %v1927_v7 }
 0x843   :  { %v643_v55 = vpop.f32.mrb[18].mxu1 }
 0x844   :  { %v648_v56 = vadd.f32 %v643_v55, %v2011_v48  ;;  %v1553_v57 = vpop.f32.mrb[19].mxu1  ;;  %v777_v48 = vsel %vm384_vm4, %v131_v45, 0  ;;  %v860_v54 = vrot.slane %v1933_v9, %v859_v17  ;;  %v1671_v45 = vld [vmem:[%s2167_s4 + $0x10] sm:$0xff]  }
 0x845   :  { %1567 = vmatpush3.bf16.msra.mxu0 %v777_v48  ;;  %v1672_v48 = vld [vmem:[%s2167_s4 + $0x18] sm:$0xff]   ;;  %s1826_s4 = smov [#allocation8]  }
 0x846   :  { %1580 = vmatprep.subr.bf16.mxu0 %v1813_v0  ;;  %s1397_s29 = sshll.u32 %s1826_s4, 4  ;;  %s1398_s29 = int_to_ptr.vmem [resolvable:$true] %s1397_s29 }
 0x847   :  { %s1757_s30 = scalar_lea.vmem %s1398_s29, 256  ;;  %p1762_p3 = scmp.lt.s32.totalorder %s1398_s29, %s1398_s29 }
 0x848   :  { %p1758_p2 = scmp.ne.s32.totalorder %s1398_s29, %s1757_s30  ;;  %p1763_p4 = scmp.lt.s32.totalorder %s1757_s30, %s1757_s30 }
 0x84a   :  { %p1764_p5 = por %p1763_p4, %p1762_p3 }
 0x84c   :  { %p1765_p6 = pnand %p1764_p5, %p1758_p2 }
 0x8a0   :  { %v714_v58 = vpop.xlane.xlu0 %713 }
 0x8a1   :  { %1701 = vrcp.f32 %v714_v58 }
 0x8a4   :  { %v717_v59 = vpop.xlane.xlu0 %716 }
 0x8a5   :  { %1703 = vrcp.f32 %v717_v59 }
 0x8ab   :  { %v1702_v60 = vpop.eup %1701 }
 0x8ac   :  { %v720_v61 = vmul.f32 %v1702_v60, %v1698_v49 }
 0x8ae   :  { %v2053_v62 = vadd.f32 %v720_v61, %v2024_v16 }
 0x8af   :  { %v1704_v63 = vpop.eup %1703 }
 0x8b0   :  { %v721_v1 = vmul.f32 %v1704_v63, %v1700_v51 }
 0x8b2   :  { %v724_v2 = vpack.c.bf16 %v721_v1, %v720_v61  ;;  %v2056_v5 = vadd.f32 %v721_v1, %v2027_v21 }
 0x8b4   :  { %1563 = vmatmul.mubr.msk.bf16.vlgmr.msra.gmra.mrb[20].mxu1 %vm183_vm3, %v724_v2 }
 0x8b5   :  { %1576 = vmatprep.mubr.msk.bf16.mxu1 %vm1814_vm0, %v1813_v0  ;;  %1573 = vmatpush3.bf16.msra.mxu1 %v1667_v39 }
 0x8b6   :  { %1574 = vmatprep.subr.bf16.mxu1 %v1813_v0 }
 0x8b9   :  { %1575 = vmatpush3.bf16.msra.mxu1 %v1668_v23 }
 0x8ba   :  { %1621 = vmatprep.subr.bf16.mxu1 %v1620_v42 }
 0x987   :  { %v765_v6 = vpop.f32.mrb[20].mxu1 }
 0x988   :  { %v1564_v8 = vpop.f32.mrb[21].mxu1 }
 0x989   :  { %v768_v10 = vpop.f32.mrb[22].mxu1  ;;  %v876_v8 = vsub.s32 1, %v1927_v7 }
 0x98a   :  { %v772_v11 = vpack.c.bf16 %v768_v10, %v765_v6  ;;  %v1565_v12 = vpop.f32.mrb[23].mxu1  ;;  %v1825_v6 = vmov 0.0|0.0  }
 0x98b   :  { %v877_v10 = vrot.slane %v1933_v9, %v876_v8 }
 0x98c   :  { %1569 = vmatmul.mubr.msk.bf16.vlgmr.msra.gmra.mrb[24].mxu0 %vm135_vm2, %v772_v11 }
 0x98d   :  { %1588 = vmatprep.mubr.msk.bf16.mxu0 %vm1814_vm0, %v1813_v0  ;;  %1581 = vmatpush3.bf16.msra.mxu0 %v1669_v43 }
 0x98e   :  { %1582 = vmatprep.subr.bf16.mxu0 %v1813_v0 }
 0x991   :  { %1583 = vmatpush3.bf16.msra.mxu0 %v1670_v44 }
 0x992   :  { %1584 = vmatprep.subr.bf16.mxu0 %v1813_v0 }
 0x995   :  { %1585 = vmatpush3.bf16.msra.mxu0 %v1671_v45 }
 0x996   :  { %1586 = vmatprep.subr.bf16.mxu0 %v1813_v0 }
 0x999   :  { %1587 = vmatpush3.bf16.msra.mxu0 %v1672_v48 }
 0xa5f   :  { %v813_v15 = vpop.f32.mrb[24].mxu0 }
 0xa60   :  { %v820_v16 = vadd.f32 %v813_v15, %v647_v53  ;;  %v1570_v20 = vpop.f32.mrb[25].mxu0 }
 0xa61   :  { %v816_v21 = vpop.f32.mrb[26].mxu0 }
 0xa62   :  { %v826_v22 = vadd.f32 %v825_v14, %v820_v16  ;;  %v821_v24 = vadd.f32 %v816_v21, %v648_v56  ;;  %v1571_v26 = vpop.f32.mrb[27].mxu0  ;;  %v865_v56 = vsub.s32 5, %v1927_v7 }
 0xa64   :  { %v827_v18 = vadd.f32 %v825_v14, %v821_v24  ;;  %v828_v19 = vadd.f32 %v826_v22, %v1913_v3  ;;  %v866_v60 = vrot.slane %v1933_v9, %v865_v56 }
 0xa66   :  { %v830_v27 = vsel %vm82_vm1, %v828_v19, 0.0  ;;  %v829_v28 = vadd.f32 %v827_v18, %v1918_v4 }
 0xa67   :  { %831 = vadd.xlane.f32.xlu0 %v830_v27 }
 0xa68   :  { %v833_v29 = vsel %vm82_vm1, %v829_v28, 0.0 }
 0xa6b   :  { %834 = vadd.xlane.f32.xlu0 %v833_v29 }
 0xaf4   :  { %v832_v3 = vpop.xlane.xlu0 %831 }
 0xaf5   :  { %v837_v31 = vmul.f32 0.03125, %v832_v3  ;;  %v947_v3 = vsub.s32 3, %v1927_v7 }
 0xaf7   :  { %v839_v32 = vsub.f32 %v828_v19, %v837_v31  ;;  %v948_v31 = vrot.slane %v1933_v9, %v947_v3 }
 0xaf8   :  { %v835_v33 = vpop.xlane.xlu0 %834 }
 0xaf9   :  { %v838_v4 = vmul.f32 0.03125, %v835_v33  ;;  %v841_v34 = vmul.f32 %v839_v32, %v839_v32 }
 0xafb   :  { %v840_v35 = vsub.f32 %v829_v28, %v838_v4  ;;  %v843_v36 = vsel %vm82_vm1, %v841_v34, 0.0 }
 0xafc   :  { %844 = vadd.xlane.f32.xlu0 %v843_v36 }
 0xafd   :  { %v842_v37 = vmul.f32 %v840_v35, %v840_v35 }
 0xaff   :  { %v846_v38 = vsel %vm82_vm1, %v842_v37, 0.0 }
 0xb00   :  { %847 = vadd.xlane.f32.xlu0 %v846_v38 }
 0xb16   :  { %1661 = vrot.lane.b32.xlu0 %v1655_v30, %s1817_s13  ;;  %v1150_v30 = vpop.permute.xlu1 %1149 }
 0xb1a   :  { %v1305_v41 = vpop.permute.xlu1 %1304 }
 0xb89   :  { %v845_v46 = vpop.xlane.xlu0 %844 }
 0xb8a   :  { %v849_v47 = vmul.f32 0.03125, %v845_v46 }
 0xb8c   :  { %v851_v49 = vadd.f32 1e-05, %v849_v47 }
 0xb8d   :  { %v848_v50 = vpop.xlane.xlu0 %847 }
 0xb8e   :  { %1705 = vrsqrt.f32 %v851_v49  ;;  %v850_v51 = vmul.f32 0.03125, %v848_v50 }
 0xb90   :  { %v852_v52 = vadd.f32 1e-05, %v850_v51 }
 0xb91   :  { %v1662_v15 = vpop.permute.xlu0 %1661 }
 0xb92   :  { %1707 = vrsqrt.f32 %v852_v52  ;;  %v1664_v24 = vunpack.i.h.bf16 %v1662_v15  ;;  %v1663_v26 = vunpack.i.l.bf16 %v1662_v15 }
 0xb94   :  { %v1627_v28 = vpack.c.bf16 %v1664_v24, %v1663_v26 }
 0xb98   :  { %v1706_v53 = vpop.eup %1705 }
 0xb99   :  { %v855_v55 = vmul.f32 %v1706_v53, %v839_v32 }
 0xb9b   :  { %v861_v58 = vmul.f32 %v860_v54, %v855_v55 }
 0xb9c   :  { %v1708_v57 = vpop.eup %1707 }
 0xb9d   :  { %v856_v59 = vmul.f32 %v1708_v57, %v840_v35  ;;  %v867_v63 = vadd.f32 %v866_v60, %v861_v58 }
 0xb9f   :  { %v862_v61 = vmul.f32 %v860_v54, %v856_v59 }
 0xba1   :  { %v868_v1 = vadd.f32 %v866_v60, %v862_v61 }
 0xba3   :  { %v869_v2 = vpack.c.bf16 %v868_v1, %v867_v63 }
 0xba5   :  { %1577 = vmatmul.mubr.msk.bf16.vlgmr.msra.gmra.mrb[24].mxu1 %vm82_vm1, %v869_v2 }
 0xba6   :  { %1596 = vmatprep.mubr.msk.f32.mxu1 %vm183_vm3, %v2053_v62  ;;  %1623 = vmatpush3.bf16.msra.mxu1 %v1620_v42 }
 0xba7   :  { %1624 = vmatprep.subr.bf16.mxu1 %v1825_v6 }
 0xbad   :  { %1597 = vmatmul.mubr.msk.f32.vlgmr.msra.gmra.mrb[28].mxu1 %vm183_vm3, %v2056_v5 }
 0xbae   :  { %1603 = vmatprep.mubr.msk.f32.mxu1 %vm1814_vm0, %v1813_v0 }
 0xc78   :  { %v927_v11 = vpop.f32.mrb[24].mxu1 }
 0xc79   :  { %v928_v12 = vadd.f32 %v927_v11, %v877_v10  ;;  %v1578_v13 = vpop.f32.mrb[25].mxu1 }
 0xc7a   :  { %v930_v14 = vpop.f32.mrb[26].mxu1 }
 0xc7b   :  { %v931_v16 = vadd.f32 %v930_v14, %v877_v10  ;;  %v1579_v20 = vpop.f32.mrb[27].mxu1  ;;  %v934_v21 = vmax.f32 %v928_v12, 0.0 }
 0xc7d   :  { %v935_v22 = vmax.f32 %v931_v16, 0.0 }
 0xc7f   :  { %v936_v18 = vpack.c.bf16 %v935_v22, %v934_v21 }
 0xc80   :  { %v1598_v19 = vpop.f32.mrb[28].mxu1 }
 0xc81   :  { %1589 = vmatmul.mubr.msk.bf16.vlgmr.msra.gmra.mrb[28].mxu0 %vm973_vm5, %v936_v18  ;;  %v1140_v27 = vpop.f32.mrb[29].mxu1 }
 0xc82   :  { %v1625_v29 = vpack.c.bf16 %v1598_v19, %v1140_v27 }
 0xc84   :  { %1626 = vmatpush3.bf16.msra.mxu1 %v1625_v29 }
 0xc85   :  { %1628 = vmatprep.subr.bf16.mxu1 %v1627_v28 }
 0xc87   :  { %1604 = vmatmul.mubr.msk.f32.vlgmr.msra.gmra.mrb[30].mxu1 %vm183_vm3, %v1150_v30 }
 0xc88   :  { %1630 = vmatpush3.bf16.msra.mxu1 %v1627_v28  ;;  %1610 = vmatprep.mubr.msk.f32.mxu1 %vm183_vm3, %v2053_v62 }
 0xc89   :  { %1631 = vmatprep.subr.bf16.mxu1 %v1825_v6 }
 0xc8b   :  { %1611 = vmatmul.mubr.msk.f32.vlgmr.msra.gmra.mrb[32].mxu1 %vm183_vm3, %v2056_v5 }
 0xc8c   :  { %1617 = vmatprep.mubr.msk.f32.mxu1 %vm1814_vm0, %v1813_v0 }
 0xd54   :  { %v1011_v32 = vpop.f32.mrb[28].mxu0 }
 0xd55   :  { %v1012_v33 = vadd.f32 %v1011_v32, %v948_v31  ;;  %v1590_v4 = vpop.f32.mrb[29].mxu0 }
 0xd56   :  { %v1014_v34 = vpop.f32.mrb[30].mxu0 }
 0xd57   :  { %v1015_v35 = vadd.f32 %v1014_v34, %v948_v31  ;;  %v1591_v36 = vpop.f32.mrb[31].mxu0  ;;  %v1018_v37 = vadd.f32 %v1012_v33, %v867_v63 }
 0xd59   :  { %v1020_v62 = vsel %vm82_vm1, %v1018_v37, 0.0  ;;  %v1019_v38 = vadd.f32 %v1015_v35, %v868_v1 }
 0xd5a   :  { %1021 = vadd.xlane.f32.xlu1 %v1020_v62  ;;  %v1219_v39 = vpop.f32.mrb[30].mxu1 }
 0xd5b   :  { %1378 = vst.msk [vmem:[#allocation8] sm:$0xff] %vm135_vm2, %v1219_v39  ;;  %v1023_v0 = vsel %vm82_vm1, %v1019_v38, 0.0  ;;  %v1605_v5 = vpop.f32.mrb[31].mxu1 }
 0xd5c   :  { %1024 = vadd.xlane.f32.xlu0 %v1023_v0 }
 0xd5e   :  { %v1612_v23 = vpop.f32.mrb[32].mxu1 }
 0xd5f   :  { %v1295_v40 = vpop.f32.mrb[33].mxu1 }
 0xd60   :  { %v1632_v25 = vpack.c.bf16 %v1612_v23, %v1295_v40 }
 0xd62   :  { %1633 = vmatpush3.bf16.msra.mxu1 %v1632_v25 }
 0xd65   :  { %1618 = vmatmul.mubr.msk.f32.vlgmr.msra.gmra.mrb[34].mxu1 %vm183_vm3, %v1305_v41 }
 0xde7   :  { %v1022_v42 = vpop.xlane.xlu1 %1021 }
 0xde8   :  { %v1026_v43 = vmul.f32 0.03125, %v1022_v42 }
 0xde9   :  { %v1025_v44 = vpop.xlane.xlu0 %1024 }
 0xdea   :  { %v1028_v46 = vsub.f32 %v1018_v37, %v1026_v43  ;;  %v1027_v47 = vmul.f32 0.03125, %v1025_v44 }
 0xdec   :  { %v1029_v49 = vsub.f32 %v1019_v38, %v1027_v47  ;;  %v1030_v50 = vmul.f32 %v1028_v46, %v1028_v46 }
 0xdee   :  { %v1032_v51 = vsel %vm82_vm1, %v1030_v50, 0.0  ;;  %v1031_v52 = vmul.f32 %v1029_v49, %v1029_v49 }
 0xdef   :  { %1033 = vadd.xlane.f32.xlu1 %v1032_v51 }
 0xdf0   :  { %v1035_v17 = vsel %vm82_vm1, %v1031_v52, 0.0 }
 0xdf3   :  { %1036 = vadd.xlane.f32.xlu1 %v1035_v17 }
 0xe38   :  { %v1374_v53 = vpop.f32.mrb[34].mxu1 }
 0xe39   :  { %1379 = vst.msk [vmem:[#allocation8 + $0x8] sm:$0xff] %vm135_vm2, %v1374_v53  ;;  %v1619_v54 = vpop.f32.mrb[35].mxu1 }
 0xe3a   :  { %1768 = shalt.err (!%p1765_p6)
}
 0xe3b   :  { %s1769_s0 = scalar_lea.hbm %s2170_s7, 256 }
 0xe3c   :  { %p1770_p7 = scmp.ne.s32.totalorder %s2170_s7, %s1769_s0  ;;  %p1773_p8 = scmp.lt.u32.totalorder %s1769_s0, %s2170_s7 }
 0xe3e   :  { %p1775_p9 = pnand %p1773_p8, %p1770_p7 }
 0xe40   :  { %1778 = shalt.err (!%p1775_p9)
}
 0xe41   :  { %s1827_s14 = smov 128   ;;  %s1828_s15 = smov 8   ;;  %v1048_v61 = vsub.s32 6, %v1927_v7  ;;  %v1054_v63 = vsub.s32 7, %v1927_v7 }
 0xe42   :  { %1403 = dma.vmem_to_hbm [thread:$0]  %s1398_s29, 256, %s2170_s7, [#allocation9], %s1827_s14, %s1827_s14, %s1828_s15  }
 0xe43   :  { %v1049_v1 = vrot.slane %v1933_v9, %v1048_v61  ;;  %v1055_v48 = vrot.slane %v1933_v9, %v1054_v63  ;;  %s1829_s7 = smov [#allocation7]  }
 0xe44   :  { %s1385_s5 = sshll.u32 %s1829_s7, 4  ;;  %s1386_s5 = int_to_ptr.vmem [resolvable:$true] %s1385_s5 }
 0xe45   :  { %s1779_s18 = scalar_lea.vmem %s1386_s5, 256  ;;  %p1784_p11 = scmp.lt.s32.totalorder %s1386_s5, %s1386_s5 }
 0xe46   :  { %p1780_p10 = scmp.ne.s32.totalorder %s1386_s5, %s1779_s18  ;;  %p1785_p12 = scmp.lt.s32.totalorder %s1779_s18, %s1779_s18 }
 0xe48   :  { %p1786_p13 = por %p1785_p12, %p1784_p11 }
 0xe4a   :  { %p1787_p0 = pnand %p1786_p13, %p1780_p10 }
 0xe7c   :  { %v1034_v55 = vpop.xlane.xlu1 %1033 }
 0xe7d   :  { %v1038_v56 = vmul.f32 0.03125, %v1034_v55 }
 0xe7f   :  { %v1040_v57 = vadd.f32 1e-05, %v1038_v56 }
 0xe80   :  { %v1037_v58 = vpop.xlane.xlu1 %1036 }
 0xe81   :  { %1709 = vrsqrt.f32 %v1040_v57  ;;  %v1039_v59 = vmul.f32 0.03125, %v1037_v58 }
 0xe83   :  { %v1041_v60 = vadd.f32 1e-05, %v1039_v59 }
 0xe85   :  { %1711 = vrsqrt.f32 %v1041_v60 }
 0xe8b   :  { %v1710_v2 = vpop.eup %1709 }
 0xe8c   :  { %v1044_v45 = vmul.f32 %v1710_v2, %v1028_v46 }
 0xe8e   :  { %v1050_v6 = vmul.f32 %v1049_v1, %v1044_v45 }
 0xe8f   :  { %v1712_v8 = vpop.eup %1711 }
 0xe90   :  { %v1045_v10 = vmul.f32 %v1712_v8, %v1029_v49  ;;  %v1056_v11 = vadd.f32 %v1055_v48, %v1050_v6 }
 0xe92   :  { %v1051_v12 = vmul.f32 %v1049_v1, %v1045_v10  ;;  %1058 = vst.msk [vmem:[#allocation7] sm:$0xff] %vm82_vm1, %v1056_v11 }
 0xe94   :  { %v1057_v13 = vadd.f32 %v1055_v48, %v1051_v12 }
 0xe96   :  { %1059 = vst.msk [vmem:[#allocation7 + $0x8] sm:$0xff] %vm82_vm1, %v1057_v13 }
 0xe97   :  { %1790 = shalt.err (!%p1787_p0)
}
 0xe98   :  { %s1791_s20 = scalar_lea.hbm %s2169_s6, 256 }
 0xe99   :  { %p1792_p1 = scmp.ne.s32.totalorder %s2169_s6, %s1791_s20  ;;  %p1795_p2 = scmp.lt.u32.totalorder %s1791_s20, %s2169_s6 }
 0xe9b   :  { %p1797_p3 = pnand %p1795_p2, %p1792_p1 }
 0xe9d   :  { %1800 = shalt.err (!%p1797_p3)
}
 0xe9e   :  { %1391 = dma.vmem_to_hbm [thread:$0]  %s1386_s5, 256, %s2169_s6, [#allocation4], %s1827_s14, %s1827_s14, %s1828_s15  }
 0xe9f   :  { %1805 = dma.done.wait [#allocation4], 256  }
 0xea0   :  { %1806 = vsyncadd [#allocation4], 4294967040 }
 0xea1   :  { %1807 = dma.done.wait [#allocation9], 256  }
 0xea2   :  { %1808 = vsyncadd [#allocation9], 4294967040 }
 0xea3   :  { %1410 = vsyncpa [#allocation3], 1 }
 0xea4   :  { %1411 = vsyncpa [#allocation6], 1 }
 0xea5   :  { %1412 = vsyncpa [#allocation4], 1 }
 0xea6   :  { %1413 = vsyncpa [#allocation9], 1 }

</bundles_post_ra>
